<compile_context>
chip_gen: v7x
topology: tpu7x:2x2x1
jax: 0.10.0
libtpu: 0.0.40
codegen_flags: <defaults>
</compile_context>

<pallas_src>
import functools

import jax
import jax.numpy as jnp
from jax.experimental import pallas as pl
from jax.experimental.pallas import tpu as pltpu

_LANES = 128
_TARGET_BLOCK_BYTES = 4 * 1024 * 1024   # ~4 MiB per block (per perf review)
_MIN_SPLIT_BYTES = 1 * 1024 * 1024      # don't split tiny arrays into 2 grid steps
_VMEM_LIMIT_BYTES = 32 * 1024 * 1024    # 2 streams x 2 bufs x 4 MiB = 16 MiB live; safe
                                        # on v5e/v6e (128 MiB) and v7x (64 MiB physical)


# ----------------------------- kernels ------------------------------------ #
def _heaviside_eval_kernel(x_ref, o_ref):
    x = x_ref[...]
    thresh = jnp.asarray(0.5, dtype=x.dtype)
    o_ref[...] = (x > thresh).astype(o_ref.dtype)


def _heaviside_train_prng_kernel(seed_ref, x_ref, o_ref):
    # Stochastic threshold drawn in-kernel from the hardware PRNG.  Mix the tile id
    # into the seed with a multiplicative hash so every grid step (and every
    # TensorCore on v7x, since the grid axis is "parallel") draws independent noise
    # and streams don't collide across calls with adjacent seeds.
    pltpu.prng_seed(seed_ref[0] + pl.program_id(0) * jnp.int32(668265263))
    bits = pltpu.bitcast(pltpu.prng_random_bits(x_ref.shape), jnp.uint32)
    # Mantissa trick: build a float in [1, 2) then subtract 1 -> U[0, 1).
    u = pltpu.bitcast((bits >> 9) | jnp.uint32(0x3F800000), jnp.float32) - 1.0
    x = x_ref[...]
    o_ref[...] = (x > u.astype(x.dtype)).astype(o_ref.dtype)


def _heaviside_train_noise_kernel(x_ref, u_ref, o_ref):
    x = x_ref[...]
    u = u_ref[...].astype(x.dtype)
    o_ref[...] = (x > u).astype(o_ref.dtype)


# ----------------------------- tiling -------------------------------------- #
def _round_up(v, m):
    return ((v + m - 1) // m) * m


def _row_tiling(rows, itemsize):
    """Pick (tile_rows, num_tiles) for a lane-dense (rows, 128) slab."""
    sub = max(8, 32 // itemsize)                 # sublane packing: 8 f32, 16 bf16, 32 i8
    row_bytes = _LANES * itemsize
    target = max(sub, (_TARGET_BLOCK_BYTES // row_bytes) // sub * sub)
    if rows <= target:
        if rows * row_bytes < _MIN_SPLIT_BYTES or rows < 2 * sub:
            # Single block == full array dims (exempt from the (8,128) rule).
            return rows, 1
        # Two blocks so both v7x TensorCores get an HBM stream to drive.
        tile = _round_up(pl.cdiv(rows, 2), sub)
        return tile, pl.cdiv(rows, tile)
    num = pl.cdiv(rows, target)
    if num % 2:                                  # best-effort even count for 2-TC v7x
        num += 1
    tile = max(sub, _round_up(pl.cdiv(rows, num), sub))
    return tile, pl.cdiv(rows, tile)


# ----------------------------- pallas driver ------------------------------- #
def _heaviside_2d(x2d, seed, training, out_dtype):
    rows = x2d.shape[0]
    tile, num_tiles = _row_tiling(rows, jnp.dtype(x2d.dtype).itemsize)

    on_tpu = jax.default_backend() == "tpu"
    compiler_params = (
        pltpu.CompilerParams(dimension_semantics=("parallel",),
                             vmem_limit_bytes=_VMEM_LIMIT_BYTES)
        if on_tpu else None
    )
    block = pl.BlockSpec((tile, _LANES), lambda i: (i, 0))
    out_shape = jax.ShapeDtypeStruct((rows, _LANES), out_dtype)

    if not training:
        return pl.pallas_call(
            _heaviside_eval_kernel,
            out_shape=out_shape,
            grid=(num_tiles,),
            in_specs=[block],
            out_specs=block,
            compiler_params=compiler_params,
        )(x2d)

    if on_tpu:
        return pl.pallas_call(
            _heaviside_train_prng_kernel,
            out_shape=out_shape,
            grid_spec=pltpu.PrefetchScalarGridSpec(
                num_scalar_prefetch=1,
                grid=(num_tiles,),
                in_specs=[pl.BlockSpec((tile, _LANES), lambda i, s: (i, 0))],
                out_specs=pl.BlockSpec((tile, _LANES), lambda i, s: (i, 0)),
            ),
            compiler_params=compiler_params,
        )(jnp.asarray(seed, dtype=jnp.int32).reshape((1,)), x2d)

    # Non-TPU fallback: pltpu.prng_* has no CPU/interpret lowering; stream
    # host-generated uniform noise through the kernel instead.
    u2d = jax.random.uniform(jax.random.PRNGKey(seed), x2d.shape, dtype=jnp.float32)
    return pl.pallas_call(
        _heaviside_train_noise_kernel,
        out_shape=out_shape,
        grid=(num_tiles,),
        in_specs=[block, block],
        out_specs=block,
        compiler_params=compiler_params,
    )(x2d, u2d)


# ------------------------------- wrapper ------------------------------------ #
@functools.partial(jax.jit, static_argnames=("training", "out_dtype"))
def heavyside_step(x, seed=0, training=False, out_dtype=None):
    """Pallas forward of `_heavyside_step_wrapper`. Accepts any shape (e.g. NCHW).

    out_dtype: optional narrower output dtype (values are only {0,1}); default
    keeps x.dtype to preserve the original module semantics.
    """
    out_dtype = jnp.dtype(x.dtype if out_dtype is None else out_dtype)
    n = x.size
    flat = x.reshape(-1)  # free (bitcast) reshape for contiguous inputs

    if n > 0 and n % _LANES == 0:
        rows = n // _LANES
        out2d = _heaviside_2d(flat.reshape(rows, _LANES), seed, training, out_dtype)
        return out2d.reshape(x.shape)

    # Ragged numel (rare for conv activations): the previous pad + trailing-slice
    # added two extra full HBM passes.  A fused XLA elementwise op is already one
    # read + one write (roofline), so use it here instead.
    # TODO(synk): switch to a boundary-masked flat Pallas kernel once 1-D
    # partial-lane blocks are verified on all target generations.
    if training:
        u = jax.random.uniform(jax.random.PRNGKey(seed), x.shape, dtype=jnp.float32)
        return (x > u.astype(x.dtype)).astype(out_dtype)
    return (x > jnp.asarray(0.5, x.dtype)).astype(out_dtype)


# --------------------------------- main -------------------------------------- #
if __name__ == "__main__":
    key = jax.random.PRNGKey(0)

    def ref(x):
        return jnp.clip(jnp.ceil(x - 0.5), 0.0, 1.0)

    # Small NCHW input consistent with the (shape-agnostic, elementwise) module.
    x = jax.random.normal(key, (2, 4, 16, 16), dtype=jnp.float32)

    # Eval-mode forward (deterministic threshold 0.5), single-block path.
    y_eval = jax.block_until_ready(heavyside_step(x, training=False))
    assert y_eval.shape == x.shape
    assert bool(jnp.array_equal(y_eval, ref(x))), "eval-mode mismatch"
    assert bool(jnp.all((y_eval == 0.0) | (y_eval == 1.0)))

    # Training-mode forward (stochastic threshold, deterministic seed).
    y_train = jax.block_until_ready(heavyside_step(x, seed=123, training=True))
    assert y_train.shape == x.shape
    assert bool(jnp.all((y_train == 0.0) | (y_train == 1.0)))

    # Mid-size input: 409600 elems -> 3200 rows -> split into 2 x 1600-row blocks.
    x_mid = jax.random.normal(jax.random.PRNGKey(1), (2, 8, 160, 160), dtype=jnp.float32)
    y_mid = jax.block_until_ready(heavyside_step(x_mid, training=False))
    assert bool(jnp.array_equal(y_mid, ref(x_mid))), "mid-size eval mismatch"

    # Boundary-masked block: 3201 rows -> tile 1608, last block partially valid.
    x_odd = jax.random.normal(jax.random.PRNGKey(2), (3201, 128), dtype=jnp.float32)
    y_odd = jax.block_until_ready(heavyside_step(x_odd, training=False))
    assert bool(jnp.array_equal(y_odd, ref(x_odd))), "masked-boundary eval mismatch"

    # Large input: 4,194,304 elems -> 32768 rows -> 4 x 8192-row (4 MiB) blocks.
    x_big = jax.random.normal(jax.random.PRNGKey(3), (1, 4, 1024, 1024), dtype=jnp.float32)
    y_big = jax.block_until_ready(heavyside_step(x_big, training=False))
    assert bool(jnp.array_equal(y_big, ref(x_big))), "large eval mismatch"

    # Ragged numel (7*13 = 91, not a multiple of 128) -> fused elementwise path.
    x_rag = jax.random.normal(jax.random.PRNGKey(4), (7, 13), dtype=jnp.float32)
    y_rag = jax.block_until_ready(heavyside_step(x_rag, training=False))
    assert bool(jnp.array_equal(y_rag, ref(x_rag))), "ragged eval mismatch"

    print("KERNEL_OK")
</pallas_src>

<mosaic_0001>
module attributes {stable_mosaic.version = 11 : i64} {
  func.func @_heaviside_eval_kernel(%arg0: i32, %arg1: memref<16x128xf32, #tpu.memory_space<vmem>>, %arg2: memref<16x128xf32, #tpu.memory_space<vmem>>) attributes {dimension_semantics = [#tpu.dimension_semantics<arbitrary>], iteration_bounds = array<i64: 1>, scalar_prefetch = 0 : i64, scratch_operands = 0 : i64, tpu.core_type = #tpu.core_type<tc>, window_params = [{transform_indices = @transform_0, window_bounds = array<i64: 16, 128>}, {transform_indices = @transform_1, window_bounds = array<i64: 16, 128>}]} {
    %c0 = arith.constant 0 : index
    %c0_0 = arith.constant 0 : index
    %0 = vector.load %arg1[%c0, %c0_0] : memref<16x128xf32, #tpu.memory_space<vmem>>, vector<16x128xf32>
    %cst = arith.constant 5.000000e-01 : f32
    %1 = vector.broadcast %cst : f32 to vector<16x128xf32>
    %2 = arith.cmpf ogt, %0, %1 : vector<16x128xf32>
    %3 = arith.extui %2 : vector<16x128xi1> to vector<16x128xi32>
    %4 = arith.sitofp %3 : vector<16x128xi32> to vector<16x128xf32>
    %c0_1 = arith.constant 0 : index
    %c0_2 = arith.constant 0 : index
    %5 = vector.load %arg2[%c0_1, %c0_2] : memref<16x128xf32, #tpu.memory_space<vmem>>, vector<16x128xf32>
    tpu.vector_store %arg2[%c0_1, %c0_2], %4 {strides = array<i32>} : memref<16x128xf32, #tpu.memory_space<vmem>>, vector<16x128xf32>,
    return
  }
  func.func @transform_0(%arg0: i32) -> (i32, i32) {
    %c0_i32 = arith.constant 0 : i32
    %c0_i32_0 = arith.constant 0 : i32
    return %arg0, %c0_i32 : i32, i32
  }
  func.func @transform_1(%arg0: i32) -> (i32, i32) {
    %c0_i32 = arith.constant 0 : i32
    %c0_i32_0 = arith.constant 0 : i32
    return %arg0, %c0_i32 : i32, i32
  }
}

</mosaic_0001>

<bundles_post_ra>
// kernel: heavyside_step.1
= control target key start
LH: loop header
LB: loop body
LE: loop exit
PB: predicated region body
PF: predicated region fallthrough
CT: control target
= control target key end

     0   :  { %v25_v2 = vmov 0.0   ;;  %s48_s0 = inlined_call_operand.vmem [shape: f32[16,128], index: 0, kind: input, shape index: {}]   ;;  %s49_s1 = inlined_call_operand.vmem [shape: f32[16,128], index: 1, kind: output, shape index: {}]  }
   0x1   :  { %v8_v0 = vld [vmem:[%s48_s0] sm:$0xff]  ;;  %v9_v1 = vld [vmem:[%s48_s0 + $0x8] sm:$0xff] }
   0x2   :  { %vm10_vm0 = vcmp.gt.f32.partialorder %v8_v0, 0.5  ;;  %vm11_vm1 = vcmp.gt.f32.partialorder %v9_v1, 0.5 }
   0x3   :  { %v22_v3 = vsel %vm10_vm0, 1.0, %v25_v2  ;;  %v23_v4 = vsel %vm11_vm1, 1.0, %v25_v2 }
   0x4   :  { %16 = vst [vmem:[%s49_s1] sm:$0xff] %v22_v3  ;;  %17 = vst [vmem:[%s49_s1 + $0x8] sm:$0xff] %v23_v4 }

</bundles_post_ra>
